<compile_context>
chip_gen: v7x
topology: tpu7x:2x2x1
jax: 0.10.0
libtpu: 0.0.40
codegen_flags: <defaults>
</compile_context>

<pallas_src>
import functools

import jax
import jax.numpy as jnp
import numpy as np
from jax.experimental import pallas as pl
from jax.experimental.pallas import tpu as pltpu


def _round_up(x: int, m: int) -> int:
    return ((x + m - 1) // m) * m


def _gram_kernel(f_ref, o_ref, acc_ref, *, reduce_mean: bool, b_orig: int,
                 l_orig: int):
    # f_ref: (1, B_pad, TL) f32   o_ref: (1, B_pad, B_pad)   acc_ref: (B_pad, B_pad) f32
    l_step = pl.program_id(1)

    @pl.when(l_step == 0)
    def _():
        acc_ref[...] = jnp.zeros_like(acc_ref)

    f = f_ref[0]                                             # (B_pad, TL) f32
    if reduce_mean:
        # Per-location mean over the B_orig *real* feature rows.  Padded rows
        # are zero, so a full-column sum equals the sum over real rows; divide
        # by the static B_orig (not B_pad).  Zero-padded L columns have mean 0
        # and stay exactly zero, so they add nothing to the gram.
        mean = jnp.sum(f, axis=0, keepdims=True) * jnp.float32(1.0 / b_orig)
        f = f - mean

    fb = f.astype(jnp.bfloat16)                              # bf16 MXU operands
    acc_ref[...] += jax.lax.dot_general(
        fb, fb,
        dimension_numbers=(((1,), (1,)), ((), ())),          # contract L; no .T
        preferred_element_type=jnp.float32)

    @pl.when(l_step == pl.num_programs(1) - 1)
    def _():
        scale = jnp.float32(1.0 / (b_orig * l_orig))         # torch: div(b*c*d)
        o_ref[0] = (acc_ref[...] * scale).astype(o_ref.dtype)


def _unfold_nchw(x, kh, kw):
    """torch.nn.functional.unfold(x, (kh, kw), padding=0, stride=1) -> (N, C*kh*kw, OH*OW)."""
    N, C, H, W = x.shape
    OH, OW = H - kh + 1, W - kw + 1
    cols = jnp.stack(
        [x[:, :, i:i + OH, j:j + OW] for i in range(kh) for j in range(kw)],
        axis=2,
    )  # (N, C, kh*kw, OH, OW): feature index = c*kh*kw + i*kw + j (torch order)
    return cols.reshape(N, C * kh * kw, OH * OW)


def extract_patches_style_gram(x, kernel_size=(7, 7), reduce_mean=True, *,
                               max_lane_tile=8192,
                               vmem_budget_bytes=40 * 1024 * 1024):
    """Forward pass of ExtractPatchesStyleGram. x: (N, C, H, W) float32."""
    kh, kw = kernel_size
    # TODO(synk): fuse the unfold into the kernel (raw NCHW image via
    # memory_space=pl.ANY + in-VMEM shifted slices) to avoid streaming the
    # kh*kw-times-redundant unfolded tensor from HBM for large images.
    feats = _unfold_nchw(x, kh, kw)                          # (N, B, L)
    N, B, L = feats.shape

    # ---- Tiling policy (all static Python math) ----------------------------
    B_pad = _round_up(B, 128)                                # 196 -> 256

    # VMEM resident per grid step: 2x input block (double buffered) + f32 acc
    # + 2x output block.  Cap TL so everything fits the budget with headroom.
    resident = 3 * B_pad * B_pad * 4
    tl_cap = (vmem_budget_bytes - resident) // (2 * 4 * B_pad)
    tl_cap = max(128, (tl_cap // 128) * 128)
    tl_cap = min(tl_cap, max_lane_tile)

    # Balanced split of L into ceil(L / tl_cap) chunks keeps padding waste ~0
    # even with large lane tiles.
    n_l_steps = -(-L // tl_cap)                              # cdiv
    TL = _round_up(-(-L // n_l_steps), 128)                  # per-step lane tile
    L_pad = n_l_steps * TL

    if (B_pad, L_pad) != (B, L):
        feats = jnp.pad(feats, ((0, 0), (0, B_pad - B), (0, L_pad - L)))

    kernel = functools.partial(_gram_kernel, reduce_mean=reduce_mean,
                               b_orig=B, l_orig=L)
    gram_p = pl.pallas_call(
        kernel,
        out_shape=jax.ShapeDtypeStruct((N, B_pad, B_pad), x.dtype),
        grid_spec=pltpu.PrefetchScalarGridSpec(
            num_scalar_prefetch=0,
            grid=(N, n_l_steps),                             # reduction axis last
            in_specs=[pl.BlockSpec((1, B_pad, TL), lambda n, l: (n, 0, l))],
            out_specs=pl.BlockSpec((1, B_pad, B_pad), lambda n, l: (n, 0, 0)),
            scratch_shapes=[pltpu.VMEM((B_pad, B_pad), jnp.float32)],
        ),
        compiler_params=pltpu.CompilerParams(
            dimension_semantics=("parallel", "arbitrary"),
            vmem_limit_bytes=48 * 1024 * 1024,               # fits v5e/v6e/v7x
        ),
    )(feats)
    gram = gram_p if B_pad == B else gram_p[:, :B, :B]
    return gram.reshape(N, B * B)


def _reference(x, kernel_size=(7, 7), reduce_mean=True):
    """Pure-JAX reference mirroring the PyTorch module."""
    kh, kw = kernel_size
    feats = _unfold_nchw(x, kh, kw)                          # (N, B, L)
    if reduce_mean:
        feats = feats - feats.mean(axis=1, keepdims=True)
    N, B, L = feats.shape
    gram = jnp.einsum("nbl,ncl->nbc", feats, feats,
                      preferred_element_type=jnp.float32) / (B * L)
    return gram.reshape(N, B * B)


if __name__ == "__main__":
    key = jax.random.PRNGKey(0)
    # Small shapes consistent with the module: batch=2, channels=4, spatial=16x16.
    x = jax.random.normal(key, (2, 4, 16, 16), dtype=jnp.float32)

    out = extract_patches_style_gram(x, kernel_size=(7, 7), reduce_mean=True)
    out = jax.block_until_ready(out)

    # Expected output: (N, (C*7*7)^2) = (2, 196*196)
    assert out.shape == (2, (4 * 7 * 7) ** 2), out.shape

    ref = jax.block_until_ready(_reference(x))
    np.testing.assert_allclose(np.asarray(out), np.asarray(ref), rtol=1e-2, atol=1e-2)

    print("KERNEL_OK")
</pallas_src>

<mosaic_0001>
module attributes {stable_mosaic.version = 11 : i64} {
  func.func @_gram_kernel(%arg0: i32, %arg1: i32, %arg2: memref<1x256x128xf32, #tpu.memory_space<vmem>>, %arg3: memref<1x256x256xf32, #tpu.memory_space<vmem>>, %arg4: memref<256x256xf32, #tpu.memory_space<vmem>>) attributes {dimension_semantics = [#tpu.dimension_semantics<parallel>, #tpu.dimension_semantics<arbitrary>], iteration_bounds = array<i64: 2, 1>, scalar_prefetch = 0 : i64, scratch_operands = 1 : i64, tpu.core_type = #tpu.core_type<tc>, window_params = [{transform_indices = @transform_0, window_bounds = array<i64: 1, 256, 128>}, {transform_indices = @transform_1, window_bounds = array<i64: 1, 256, 256>}]} {
    %c0_i32 = arith.constant 0 : i32
    %0 = arith.cmpi eq, %arg1, %c0_i32 : i32
    %1 = arith.extui %0 : i1 to i32
    %c0_i32_0 = arith.constant 0 : i32
    %2 = arith.cmpi ne, %1, %c0_i32_0 : i32
    scf.if %2 {
      %cst_11 = arith.constant 0.000000e+00 : f32
      %19 = vector.broadcast %cst_11 : f32 to vector<256x256xf32>
      %c0_12 = arith.constant 0 : index
      %c0_13 = arith.constant 0 : index
      %20 = vector.load %arg4[%c0_12, %c0_13] : memref<256x256xf32, #tpu.memory_space<vmem>>, vector<256x256xf32>
      tpu.vector_store %arg4[%c0_12, %c0_13], %19 {strides = array<i32>} : memref<256x256xf32, #tpu.memory_space<vmem>>, vector<256x256xf32>,
    } else {
    }
    %c0 = arith.constant 0 : index
    %c0_1 = arith.constant 0 : index
    %c0_2 = arith.constant 0 : index
    %3 = vector.load %arg2[%c0, %c0_1, %c0_2] : memref<1x256x128xf32, #tpu.memory_space<vmem>>, vector<1x256x128xf32>
    %4 = vector.shape_cast %3 : vector<1x256x128xf32> to vector<256x128xf32>
    %cst = arith.constant dense<0.000000e+00> : vector<128xf32>
    %5 = vector.multi_reduction <add>, %4, %cst [0] : vector<256x128xf32> to vector<128xf32>
    %6 = vector.shape_cast %5 : vector<128xf32> to vector<1x128xf32>
    %cst_3 = arith.constant 0.00510204071 : f32
    %7 = vector.broadcast %cst_3 : f32 to vector<1x128xf32>
    %8 = arith.mulf %6, %7 : vector<1x128xf32>
    %9 = vector.broadcast %8 : vector<1x128xf32> to vector<256x128xf32>
    %10 = arith.subf %4, %9 : vector<256x128xf32>
    %11 = arith.truncf %10 : vector<256x128xf32> to vector<256x128xbf16>
    %c0_4 = arith.constant 0 : index
    %c0_5 = arith.constant 0 : index
    %12 = vector.load %arg4[%c0_4, %c0_5] : memref<256x256xf32, #tpu.memory_space<vmem>>, vector<256x256xf32>
    %cst_6 = arith.constant dense<0.000000e+00> : vector<256x256xf32>
    %13 = tpu.matmul %11, %11, %cst_6 {dimension_numbers = #tpu.dot_dimension_numbers<[1], [1], [0], [0], [0, 0, 1, 0], [], []>} : vector<256x128xbf16>, vector<256x128xbf16>, vector<256x256xf32> -> vector<256x256xf32>
    %14 = arith.addf %12, %13 : vector<256x256xf32>
    %c0_7 = arith.constant 0 : index
    %c0_8 = arith.constant 0 : index
    %15 = vector.load %arg4[%c0_7, %c0_8] : memref<256x256xf32, #tpu.memory_space<vmem>>, vector<256x256xf32>
    tpu.vector_store %arg4[%c0_7, %c0_8], %14 {strides = array<i32>} : memref<256x256xf32, #tpu.memory_space<vmem>>, vector<256x256xf32>,
    %c0_i32_9 = arith.constant 0 : i32
    %16 = arith.cmpi eq, %arg1, %c0_i32_9 : i32
    %17 = arith.extui %16 : i1 to i32
    %c0_i32_10 = arith.constant 0 : i32
    %18 = arith.cmpi ne, %17, %c0_i32_10 : i32
    scf.if %18 {
      %c0_11 = arith.constant 0 : index
      %c0_12 = arith.constant 0 : index
      %19 = vector.load %arg4[%c0_11, %c0_12] : memref<256x256xf32, #tpu.memory_space<vmem>>, vector<256x256xf32>
      %cst_13 = arith.constant 5.10204081E-5 : f32
      %20 = vector.broadcast %cst_13 : f32 to vector<256x256xf32>
      %21 = arith.mulf %19, %20 : vector<256x256xf32>
      %c0_14 = arith.constant 0 : index
      %c0_15 = arith.constant 0 : index
      %c0_16 = arith.constant 0 : index
      %22 = vector.load %arg3[%c0_14, %c0_15, %c0_16] : memref<1x256x256xf32, #tpu.memory_space<vmem>>, vector<1x256x256xf32>
      %23 = vector.shape_cast %22 : vector<1x256x256xf32> to vector<256x256xf32>
      %24 = vector.shape_cast %21 : vector<256x256xf32> to vector<1x256x256xf32>
      tpu.vector_store %arg3[%c0_14, %c0_15, %c0_16], %24 {strides = array<i32>} : memref<1x256x256xf32, #tpu.memory_space<vmem>>, vector<1x256x256xf32>,
    } else {
    }
    return
  }
  func.func @transform_0(%arg0: i32, %arg1: i32) -> (i32, i32, i32) {
    %c0_i32 = arith.constant 0 : i32
    %c0_i32_0 = arith.constant 0 : i32
    return %arg0, %c0_i32, %arg1 : i32, i32, i32
  }
  func.func @transform_1(%arg0: i32, %arg1: i32) -> (i32, i32, i32) {
    %c0_i32 = arith.constant 0 : i32
    %c0_i32_0 = arith.constant 0 : i32
    %c0_i32_1 = arith.constant 0 : i32
    return %arg0, %c0_i32, %c0_i32_0 : i32, i32, i32
  }
}

</mosaic_0001>

<bundles_post_ra>
// kernel: tpu_custom_call.1
= control target key start
LH: loop header
LB: loop body
LE: loop exit
PB: predicated region body
PF: predicated region fallthrough
CT: control target
= control target key end

     0   :  { %6 = vsyncpa [#allocation4], 0  ;;  %s1746_s0 = inlined_call_operand.hbm [shape: f32[2,256,128], index: 0, kind: input, shape index: {}]   ;;  %s1747_s1 = inlined_call_operand.hbm [shape: f32[2,256,256], index: 1, kind: output, shape index: {}]  }
   0x1   :  { %8 = vsyncpa [#allocation4 + $0x1], 0 }
   0x2   :  { %9 = vsyncpa [#allocation5], 0 }
   0x3   :  { %11 = vsyncpa [#allocation5 + $0x1], 0  ;;  %s1291_s6 = smov 0   ;;  %s1293_s7 = smov 0  }
   0x4   :  { %s1295_s8 = smov 0   ;;  %s1297_s9 = smov 0  }
   0x5   :  { %s1299_s10 = smov 0   ;;  %s1301_s11 = smov 0  }
   0x6 LB: > { %s1014_s12 = sadd.s32 4294967295, %s1273_s11   ;;  %s1015_s13 = sadd.s32 4294967294, %s1273_s11   ;;  %s1273_s11 = sphi %s1301_s11, %s17_s11   ;;  %s1269_s10 = sphi %s1299_s10, %s1762_s10   ;;  %s1265_s9 = sphi %s1297_s9, %s1761_s9   ;;  %s1261_s8 = sphi %s1295_s8, %s1760_s8   ;;  %s1257_s7 = sphi %s1293_s7, %s1759_s7   ;;  %s1253_s6 = sphi %s1291_s6, %s1758_s6  }
   0x7   : > { %s29_s14 = sadd.s32 1, %s1269_s10  ;;  %s38_s15 = sadd.s32 1, %s1261_s8 }
   0x8   : > { %p31_p0 = scmp.ge.s32.totalorder %s29_s14, 2  ;;  %p45_p1 = scmp.ne.s32.totalorder %s1261_s8, %s1257_s7 }
   0x9   : > { %p46_p2 = scmp.eq.s32.totalorder %s1273_s11, 0  ;;  %p51_p3 = scmp.ne.s32.totalorder %s1257_s7, %s1253_s6 }
   0xa   : > { %s1764_s14 = smov (%p31_p0, %s29_s14), 0  ;;  %p52_p5 = scmp.eq.s32.totalorder %s1014_s12, 0 }
   0xb   : > { %p1332_p4 = por %p46_p2, %p45_p1  ;;  %s33_s17 = ssub.s32 %s1269_s10, %s1764_s14 }
   0xc   : > { %p75_p6 = scmp.eq.s32.totalorder %s1014_s12, 1  ;;  %p36_p7 = scmp.eq.s32.totalorder %s33_s17, 0 }
   0xd   : > { %p1338_p8 = por %p52_p5, %p51_p3  ;;  %p81_p10 = scmp.eq.s32.totalorder %s1015_s13, 1 }
   0xe   : > { %p1342_p9 = por %p75_p6, %p45_p1  ;;  %p1107_p13 = scmp.lt.s32.totalorder %s1273_s11, 2 }
   0xf   : > { %s1347_s20 = scalar_select %p36_p7, %s1261_s8, %s38_s15  }
  0x10   : > { %s1751_s19 = scalar_select %p1342_p9, 1, 0 }
  0x11   : > { %p1349_p11 = por %p81_p10, %p51_p3  ;;  %s101_s22 = sand.u32 1, %s1261_s8  }
  0x12   : > { %s1018_s23 = sshll.u32 %s101_s22, 8  ;;  %s1029_s24 = sshll.u32 %s1269_s10, 12 }
  0x13   : > { %s1752_s21 = scalar_select %p1349_p11, 1, 0 }
  0x14   : > { %s1360_s27 = scalar_lea.hbm %s1746_s0, %s1029_s24  ;;  %s105_s28 = scalar_lea.vmem [#allocation3], %s1018_s23 }
  0x15   : > { %s113_s29 = sshll.u32 %s105_s28, 4  ;;  %p1366_p0 = pnand %p1107_p13, %p1332_p4  ;;  %s1362_s29 = int_to_ptr.vmem [resolvable:$true] %s113_s29 }
  0x16   : > { %s1371_s2 = scalar_lea.sflag [#allocation4], %s101_s22  ;;  %s1161_s3 = scalar_lea.hbm %s1360_s27, 4096 }
  0x17   : > { %p1162_p2 = scmp.ne.s32.totalorder %s1360_s27, %s1161_s3  ;;  %p1163_p3 = pneg %p1366_p0 }
  0x18   : > { %s1166_s12 = scalar_lea.hbm %s1746_s0, 8192  ;;  %p1167_p4 = scmp.lt.u32.totalorder %s1360_s27, %s1746_s0 }
  0x19   : > { %p1164_p5 = pnand %p1163_p3, %p1162_p2  ;;  %p1168_p7 = scmp.lt.u32.totalorder %s1166_s12, %s1161_s3 }
  0x1a   : > { %p1170_p13 = scmp.lt.u32.totalorder %s1161_s3, %s1360_s27 }
  0x1b   : > { %p1165_p6 = pneg %p1164_p5  ;;  %p1169_p10 = por %p1168_p7, %p1167_p4 }
  0x1d   : > { %p1171_p12 = por %p1170_p13, %p1169_p10 }
  0x1f   : > { %p1172_p1 = pnand %p1171_p12, %p1165_p6 }
  0x21   : > { %1175 = shalt.err (!%p1172_p1)
}
  0x22   : > { %s1176_s16 = scalar_lea.vmem %s1362_s29, 4096  ;;  %s1275_s17 = smov [#allocation3]  }
  0x23   : > { %p1177_p2 = scmp.ne.s32.totalorder %s1362_s29, %s1176_s16  ;;  %s1181_s22 = sshll.u32 %s1275_s17, 4  ;;  %s1182_s22 = int_to_ptr.vmem [resolvable:$false] %s1181_s22 }
  0x24   : > { %s1183_s23 = scalar_lea.vmem %s1182_s22, 8192  ;;  %p1184_p9 = scmp.lt.s32.totalorder %s1362_s29, %s1182_s22 }
  0x25   : > { %p1179_p5 = pnand %p1177_p2, %p1163_p3  ;;  %p1185_p4 = scmp.lt.s32.totalorder %s1183_s23, %s1176_s16 }
  0x27   : > { %p1180_p11 = pneg %p1179_p5  ;;  %p1186_p7 = por %p1185_p4, %p1184_p9 }
  0x29   : > { %p1187_p10 = pnand %p1186_p7, %p1180_p11 }
  0x2b   : > { %1190 = shalt.err (!%p1187_p10)
}
  0x2c   : > { %s1276_s24 = smov 128   ;;  %s1277_s25 = smov 8  }
  0x2d   : > { %1102 = dma.hbm_to_vmem [thread:$0]  (!%p1366_p0), %s1360_s27, 4096, %s1362_s29, %s1371_s2, %s1276_s24, %s1276_s24, %s1277_s25  }
  0x2e   : > { %p121_p12 = scmp.lt.s32.totalorder %s1273_s11, 3  ;;  %p1754_p1 = scmp.ge.s32.totalorder %s1273_s11, 1 }
  0x30   : > { %p122_p3 = pnand %p1754_p1, %p121_p12 }
  0x31   : > { %s1403_s26 = sand.u32 (!%p122_p3), 1, %s1257_s7  }
  0x32   : > { %125 = sbr.rel (%p122_p3) target bundleno = 492 (0x1ec), region = 24  ;;  %s1022_s28 = sshll.u32 (!%p122_p3), %s1403_s26, 8 }
  0x33   : > { %s128_s3 = scalar_lea.sflag (!%p122_p3), [#allocation4], %s1403_s26  ;;  %s1407_s4 = scalar_lea.vmem (!%p122_p3), [#allocation3], %s1022_s28 }
  0x39   : > { %1244 = dma.done.wait (%p1338_p8), %s128_s3, 4096  }
  0x3a   : > { %1246 = vsyncadd (%p1338_p8), %s128_s3, 4294963200  ;;  %v1414_v0 = vld [vmem:[%s1407_s4] sm:$0xff]  ;;  %v1417_v1 = vld [vmem:[%s1407_s4 + $0x8] sm:$0xff]  ;;  %s1023_s18 = sshll.u32 %s1403_s26, 9  ;;  %s1030_s29 = sshll.u32 %s1265_s9, 13 }
  0x3b   : > { %v1420_v2 = vld [vmem:[%s1407_s4 + $0x10] sm:$0xff]  ;;  %v251_v3 = vadd.f32 %v1417_v1, %v1414_v0  ;;  %v1425_v4 = vld [vmem:[%s1407_s4 + $0x18] sm:$0xff]  ;;  %v1429_v6 = vld [vmem:[%s1407_s4 + $0x20] sm:$0xff]  ;;  %s1624_s27 = scalar_lea.vmem [#allocation6], %s1023_s18  ;;  %s1689_s5 = scalar_lea.hbm %s1747_s1, %s1030_s29 }
  0x3c   : > { %v1433_v8 = vld [vmem:[%s1407_s4 + $0x28] sm:$0xff]  ;;  %v1437_v10 = vld [vmem:[%s1407_s4 + $0x30] sm:$0xff]  ;;  %v1441_v12 = vld [vmem:[%s1407_s4 + $0x38] sm:$0xff]  ;;  %s931_s30 = sshll.u32 %s1624_s27, 4  ;;  %s918_s12 = scalar_lea.sflag [#allocation5], %s1403_s26  ;;  %s1691_s30 = int_to_ptr.vmem [resolvable:$true] %s931_s30 }
  0x3d   : > { %v252_v5 = vadd.f32 %v251_v3, %v1420_v2  ;;  %v1445_v14 = vld [vmem:[%s1407_s4 + $0x40] sm:$0xff]  ;;  %v1449_v16 = vld [vmem:[%s1407_s4 + $0x48] sm:$0xff]  ;;  %v1453_v18 = vld [vmem:[%s1407_s4 + $0x50] sm:$0xff]  ;;  %s1191_s13 = scalar_lea.vmem %s1691_s30, 8192  ;;  %p1755_p9 = scmp.ne.s32.totalorder %s1751_s19, 0 }
  0x3e   : > { %v1457_v20 = vld [vmem:[%s1407_s4 + $0x58] sm:$0xff]  ;;  %v1461_v22 = vld [vmem:[%s1407_s4 + $0x60] sm:$0xff]  ;;  %v1465_v24 = vld [vmem:[%s1407_s4 + $0x68] sm:$0xff]  ;;  %p1192_p8 = scmp.ne.s32.totalorder %s1691_s30, %s1191_s13  ;;  %s1278_s15 = smov [#allocation6]  }
  0x3f   : > { %v253_v7 = vadd.f32 %v252_v5, %v1425_v4  ;;  %v1469_v26 = vld [vmem:[%s1407_s4 + $0x70] sm:$0xff]  ;;  %v1473_v28 = vld [vmem:[%s1407_s4 + $0x78] sm:$0xff]  ;;  %v235_v30 = vld [vmem:[%s1407_s4 + $0x80] sm:$0xff]  ;;  %s1195_s16 = sshll.u32 %s1278_s15, 4  ;;  %s1196_s16 = int_to_ptr.vmem [resolvable:$false] %s1195_s16 }
  0x40   : > { %v236_v32 = vld [vmem:[%s1407_s4 + $0x88] sm:$0xff]  ;;  %v237_v34 = vld [vmem:[%s1407_s4 + $0x90] sm:$0xff]  ;;  %v238_v36 = vld [vmem:[%s1407_s4 + $0x98] sm:$0xff]  ;;  %p1193_p11 = pnand %p1192_p8, %p1755_p9  ;;  %s1197_s17 = scalar_lea.vmem %s1196_s16, 16384 }
  0x41   : > { %v254_v9 = vadd.f32 %v253_v7, %v1429_v6  ;;  %v239_v38 = vld [vmem:[%s1407_s4 + $0xa0] sm:$0xff]  ;;  %v240_v40 = vld [vmem:[%s1407_s4 + $0xa8] sm:$0xff]  ;;  %v1484_v42 = vld [vmem:[%s1407_s4 + $0xb0] sm:$0xff]  ;;  %p1198_p6 = scmp.lt.s32.totalorder %s1691_s30, %s1196_s16  ;;  %p1199_p13 = scmp.lt.s32.totalorder %s1197_s17, %s1191_s13 }
  0x42   : > { %v1487_v44 = vld [vmem:[%s1407_s4 + $0xb8] sm:$0xff]  ;;  %v1491_v46 = vld [vmem:[%s1407_s4 + $0xc0] sm:$0xff]  ;;  %v1495_v48 = vld [vmem:[%s1407_s4 + $0xc8] sm:$0xff]  ;;  %p1194_p0 = pneg %p1193_p11 }
  0x43   : > { %v255_v11 = vadd.f32 %v254_v9, %v1433_v8  ;;  %v1499_v50 = vld [vmem:[%s1407_s4 + $0xd0] sm:$0xff]  ;;  %v1503_v52 = vld [vmem:[%s1407_s4 + $0xd8] sm:$0xff]  ;;  %v1507_v54 = vld [vmem:[%s1407_s4 + $0xe0] sm:$0xff]  ;;  %p1200_p2 = por %p1199_p13, %p1198_p6 }
  0x44   : > { %v1511_v56 = vld [vmem:[%s1407_s4 + $0xe8] sm:$0xff]  ;;  %v249_v58 = vld [vmem:[%s1407_s4 + $0xf0] sm:$0xff]  ;;  %v250_v60 = vld [vmem:[%s1407_s4 + $0xf8] sm:$0xff] }
  0x45   : > { %v256_v13 = vadd.f32 %v255_v11, %v1437_v10  ;;  %p1201_p5 = pnand %p1200_p2, %p1194_p0 }
  0x47   : > { %v257_v15 = vadd.f32 %v256_v13, %v1441_v12 }
  0x49   : > { %v258_v17 = vadd.f32 %v257_v15, %v1445_v14 }
  0x4b   : > { %v259_v19 = vadd.f32 %v258_v17, %v1449_v16 }
  0x4d   : > { %v260_v21 = vadd.f32 %v259_v19, %v1453_v18 }
  0x4f   : > { %v261_v23 = vadd.f32 %v260_v21, %v1457_v20 }
  0x51   : > { %v262_v25 = vadd.f32 %v261_v23, %v1461_v22 }
  0x53   : > { %v263_v27 = vadd.f32 %v262_v25, %v1465_v24 }
  0x55   : > { %v264_v29 = vadd.f32 %v263_v27, %v1469_v26 }
  0x57   : > { %v265_v31 = vadd.f32 %v264_v29, %v1473_v28 }
  0x59   : > { %v266_v33 = vadd.f32 %v265_v31, %v235_v30 }
  0x5b   : > { %v267_v35 = vadd.f32 %v266_v33, %v236_v32 }
  0x5d   : > { %v268_v37 = vadd.f32 %v267_v35, %v237_v34 }
  0x5f   : > { %v269_v39 = vadd.f32 %v268_v37, %v238_v36 }
  0x61   : > { %v270_v41 = vadd.f32 %v269_v39, %v239_v38 }
  0x63   : > { %v271_v43 = vadd.f32 %v270_v41, %v240_v40 }
  0x65   : > { %v272_v45 = vadd.f32 %v271_v43, %v1484_v42 }
  0x67   : > { %v273_v47 = vadd.f32 %v272_v45, %v1487_v44 }
  0x69   : > { %v274_v49 = vadd.f32 %v273_v47, %v1491_v46 }
  0x6b   : > { %v275_v51 = vadd.f32 %v274_v49, %v1495_v48 }
  0x6d   : > { %v276_v53 = vadd.f32 %v275_v51, %v1499_v50 }
  0x6f   : > { %v277_v55 = vadd.f32 %v276_v53, %v1503_v52 }
  0x71   : > { %v278_v57 = vadd.f32 %v277_v55, %v1507_v54 }
  0x73   : > { %v279_v59 = vadd.f32 %v278_v57, %v1511_v56 }
  0x75   : > { %v280_v61 = vadd.f32 %v279_v59, %v249_v58 }
  0x77   : > { %v281_v62 = vadd.f32 %v280_v61, %v250_v60 }
  0x79   : > { %v282_v63 = vrot.slane %v281_v62, 4 }
  0x7b   : > { %v283_v3 = vadd.f32 %v282_v63, %v281_v62 }
  0x7d   : > { %v284_v5 = vrot.slane %v283_v3, 2 }
  0x7f   : > { %v285_v7 = vadd.f32 %v284_v5, %v283_v3 }
  0x81   : > { %v286_v9 = vrot.slane %v285_v7, 1 }
  0x83   : > { %v287_v11 = vadd.f32 %v286_v9, %v285_v7 }
  0x85   : > { %v1517_v13 = vmul.f32 0.0051020407, %v287_v11 }
  0x87   : > { %v305_v15 = vsub.f32 %v235_v30, %v1517_v13  ;;  %v306_v17 = vsub.f32 %v236_v32, %v1517_v13  ;;  %v289_v19 = vsub.f32 %v1414_v0, %v1517_v13  ;;  %v290_v21 = vsub.f32 %v1417_v1, %v1517_v13 }
  0x88   : > { %v307_v23 = vsub.f32 %v237_v34, %v1517_v13  ;;  %v308_v25 = vsub.f32 %v238_v36, %v1517_v13  ;;  %v291_v0 = vsub.f32 %v1420_v2, %v1517_v13  ;;  %v292_v1 = vsub.f32 %v1425_v4, %v1517_v13 }
  0x89   : > { %v1527_v27 = vpack.c.bf16 %v306_v17, %v305_v15  ;;  %v1529_v29 = vpack.c.bf16 %v290_v21, %v289_v19  ;;  %v309_v30 = vsub.f32 %v239_v38, %v1517_v13  ;;  %v310_v32 = vsub.f32 %v240_v40, %v1517_v13 }
  0x8a   : > { %v1531_v31 = vpack.c.bf16 %v308_v25, %v307_v23  ;;  %v1547_v33 = vpack.c.bf16 %v292_v1, %v291_v0  ;;  %v301_v2 = vsub.f32 %v1461_v22, %v1517_v13  ;;  %v302_v4 = vsub.f32 %v1465_v24, %v1517_v13 }
  0x8b   : > { %1031 = vmatprep.subr.bf16.mxu0 %v1527_v27  ;;  %1079 = vmatprep.subr.bf16.mxu1 %v1527_v27  ;;  %v1551_v34 = vpack.c.bf16 %v310_v32, %v309_v30  ;;  %v319_v35 = vsub.f32 %v249_v58, %v1517_v13  ;;  %v320_v36 = vsub.f32 %v250_v60, %v1517_v13 }
  0x8c   : > { %1032 = vmatpush3.bf16.xpose.msra.mxu0 %v1529_v29  ;;  %1087 = vmatpush3.bf16.xpose.msra.mxu1 %v1529_v29  ;;  %v303_v37 = vsub.f32 %v1469_v26, %v1517_v13  ;;  %v304_v38 = vsub.f32 %v1473_v28, %v1517_v13  ;;  %v293_v39 = vsub.f32 %v1429_v6, %v1517_v13 }
  0x8d   : > { %1033 = vmatprep.subr.bf16.mxu0 %v1531_v31  ;;  %1080 = vmatprep.subr.bf16.mxu1 %v1531_v31  ;;  %v1563_v40 = vpack.c.bf16 %v302_v4, %v301_v2  ;;  %v294_v22 = vsub.f32 %v1433_v8, %v1517_v13  ;;  %v1569_v24 = vpack.c.bf16 %v320_v36, %v319_v35 }
  0x8e   : > { %1047 = vmatprep.mubr.bf16.mxu0 %v1529_v29  ;;  %1063 = vmatprep.mubr.bf16.mxu1 %v1527_v27  ;;  %v1571_v41 = vpack.c.bf16 %v304_v38, %v303_v37  ;;  %v311_v6 = vsub.f32 %v1484_v42, %v1517_v13  ;;  %v312_v26 = vsub.f32 %v1487_v44, %v1517_v13 }
  0x8f   : > { %v323_v28 = vpack.c.bf16 %v294_v22, %v293_v39  ;;  %v295_v8 = vsub.f32 %v1437_v10, %v1517_v13  ;;  %v296_v45 = vsub.f32 %v1441_v12, %v1517_v13  ;;  %v313_v47 = vsub.f32 %v1491_v46, %v1517_v13 }
  0x90   : > { %v332_v43 = vpack.c.bf16 %v312_v26, %v311_v6  ;;  %v314_v42 = vsub.f32 %v1495_v48, %v1517_v13  ;;  %v297_v51 = vsub.f32 %v1445_v14, %v1517_v13  ;;  %v298_v10 = vsub.f32 %v1449_v16, %v1517_v13 }
  0x91   : > { %v324_v49 = vpack.c.bf16 %v296_v45, %v295_v8  ;;  %v315_v12 = vsub.f32 %v1499_v50, %v1517_v13  ;;  %v316_v46 = vsub.f32 %v1503_v52, %v1517_v13  ;;  %v299_v55 = vsub.f32 %v1453_v18, %v1517_v13 }
  0x92   : > { %v333_v44 = vpack.c.bf16 %v314_v42, %v313_v47  ;;  %v325_v53 = vpack.c.bf16 %v298_v10, %v297_v51  ;;  %v300_v14 = vsub.f32 %v1457_v20, %v1517_v13  ;;  %v317_v16 = vsub.f32 %v1507_v54, %v1517_v13 }
  0x93   : > { %v334_v48 = vpack.c.bf16 %v316_v46, %v315_v12  ;;  %v318_v50 = vsub.f32 %v1511_v56, %v1517_v13 }
  0x94   : > { %1034 = vmatpush3.bf16.xpose.msra.mxu0 %v1547_v33  ;;  %1088 = vmatpush3.bf16.xpose.msra.mxu1 %v1547_v33  ;;  %v326_v57 = vpack.c.bf16 %v300_v14, %v299_v55 }
  0x95   : > { %1035 = vmatprep.subr.bf16.mxu0 %v1551_v34  ;;  %1081 = vmatprep.subr.bf16.mxu1 %v1551_v34  ;;  %v335_v52 = vpack.c.bf16 %v318_v50, %v317_v16 }
  0x9c   : > { %1036 = vmatpush3.bf16.xpose.msra.mxu0 %v323_v28  ;;  %1089 = vmatpush3.bf16.xpose.msra.mxu1 %v323_v28 }
  0x9d   : > { %1037 = vmatprep.subr.bf16.mxu0 %v332_v43  ;;  %1082 = vmatprep.subr.bf16.mxu1 %v332_v43 }
  0xa4   : > { %1038 = vmatpush3.bf16.xpose.msra.mxu0 %v324_v49  ;;  %1090 = vmatpush3.bf16.xpose.msra.mxu1 %v324_v49 }
  0xa5   : > { %1039 = vmatprep.subr.bf16.mxu0 %v333_v44  ;;  %1083 = vmatprep.subr.bf16.mxu1 %v333_v44 }
  0xac   : > { %1040 = vmatpush3.bf16.xpose.msra.mxu0 %v325_v53  ;;  %1091 = vmatpush3.bf16.xpose.msra.mxu1 %v325_v53 }
  0xad   : > { %1041 = vmatprep.subr.bf16.mxu0 %v334_v48  ;;  %1084 = vmatprep.subr.bf16.mxu1 %v334_v48 }
  0xb4   : > { %1042 = vmatpush3.bf16.xpose.msra.mxu0 %v326_v57  ;;  %1092 = vmatpush3.bf16.xpose.msra.mxu1 %v326_v57 }
  0xb5   : > { %1043 = vmatprep.subr.bf16.mxu0 %v335_v52  ;;  %1085 = vmatprep.subr.bf16.mxu1 %v335_v52 }
  0xbc   : > { %1044 = vmatpush3.bf16.xpose.msra.mxu0 %v1563_v40  ;;  %1093 = vmatpush3.bf16.xpose.msra.mxu1 %v1563_v40 }
  0xbd   : > { %1045 = vmatprep.subr.bf16.mxu0 %v1569_v24  ;;  %1086 = vmatprep.subr.bf16.mxu1 %v1569_v24 }
  0xc4   : > { %1046 = vmatpush3.bf16.xpose.msra.mxu0 %v1571_v41  ;;  %1094 = vmatpush3.bf16.xpose.msra.mxu1 %v1571_v41 }
  0xcb   : > { %1048 = vmatmul.mubr.bf16.vlgmr.msra.gmra.mrb[0].mxu0 %v1529_v29  ;;  %1064 = vmatmul.mubr.bf16.vlgmr.msra.gmra.mrb[0].mxu1 %v1527_v27 }
  0xcc   : > { %1049 = vmatprep.mubr.bf16.mxu0 %v1547_v33  ;;  %1065 = vmatprep.mubr.bf16.mxu1 %v1531_v31 }
  0xd3   : > { %1050 = vmatmul.mubr.bf16.gmra.mrb[4].mxu0 %v1547_v33  ;;  %1066 = vmatmul.mubr.bf16.gmra.mrb[4].mxu1 %v1531_v31 }
  0xd4   : > { %1051 = vmatprep.mubr.bf16.mxu0 %v323_v28  ;;  %1067 = vmatprep.mubr.bf16.mxu1 %v1551_v34 }
  0xdb   : > { %1052 = vmatmul.mubr.bf16.gmra.mrb[8].mxu0 %v323_v28  ;;  %1068 = vmatmul.mubr.bf16.gmra.mrb[8].mxu1 %v1551_v34 }
  0xdc   : > { %1053 = vmatprep.mubr.bf16.mxu0 %v324_v49  ;;  %1069 = vmatprep.mubr.bf16.mxu1 %v332_v43 }
  0xe3   : > { %1054 = vmatmul.mubr.bf16.gmra.mrb[12].mxu0 %v324_v49  ;;  %1070 = vmatmul.mubr.bf16.gmra.mrb[12].mxu1 %v332_v43 }
  0xe4   : > { %1055 = vmatprep.mubr.bf16.mxu0 %v325_v53  ;;  %1071 = vmatprep.mubr.bf16.mxu1 %v333_v44 }
  0xeb   : > { %1056 = vmatmul.mubr.bf16.gmra.mrb[16].mxu0 %v325_v53  ;;  %1072 = vmatmul.mubr.bf16.gmra.mrb[16].mxu1 %v333_v44 }
  0xec   : > { %1057 = vmatprep.mubr.bf16.mxu0 %v326_v57  ;;  %1073 = vmatprep.mubr.bf16.mxu1 %v334_v48 }
  0xf3   : > { %1058 = vmatmul.mubr.bf16.gmra.mrb[20].mxu0 %v326_v57  ;;  %1074 = vmatmul.mubr.bf16.gmra.mrb[20].mxu1 %v334_v48 }
  0xf4   : > { %1059 = vmatprep.mubr.bf16.mxu0 %v1563_v40  ;;  %1075 = vmatprep.mubr.bf16.mxu1 %v335_v52 }
  0xfb   : > { %1060 = vmatmul.mubr.bf16.gmra.mrb[24].mxu0 %v1563_v40  ;;  %1076 = vmatmul.mubr.bf16.gmra.mrb[24].mxu1 %v335_v52 }
  0xfc   : > { %1061 = vmatprep.mubr.bf16.mxu0 %v1571_v41  ;;  %1077 = vmatprep.mubr.bf16.mxu1 %v1569_v24 }
 0x103   : > { %1062 = vmatmul.mubr.bf16.gmra.mrb[28].mxu0 %v1571_v41  ;;  %1078 = vmatmul.mubr.bf16.gmra.mrb[28].mxu1 %v1569_v24 }
 0x19e   : > { %v435_v18 = vpop.f32.mrb[0].mxu0  ;;  %v515_v20 = vpop.f32.mrb[0].mxu1 }
 0x19f   : > { %v789_v54 = vmul.f32 5.1020408e-05, %v435_v18  ;;  %v821_v56 = vmul.f32 5.1020408e-05, %v515_v20  ;;  %v437_v58 = vpop.f32.mrb[1].mxu0  ;;  %v517_v59 = vpop.f32.mrb[1].mxu1 }
 0x1a0   : > { %v790_v60 = vmul.f32 5.1020408e-05, %v437_v58  ;;  %v822_v61 = vmul.f32 5.1020408e-05, %v517_v59  ;;  %v439_v62 = vpop.f32.mrb[2].mxu0  ;;  %v519_v63 = vpop.f32.mrb[2].mxu1 }
 0x1a1   : > { %853 = vst [vmem:[%s1624_s27] sm:$0xff] %v789_v54  ;;  %885 = vst [vmem:[%s1624_s27 + $0x100] sm:$0xff] %v821_v56  ;;  %v791_v3 = vmul.f32 5.1020408e-05, %v439_v62  ;;  %v823_v5 = vmul.f32 5.1020408e-05, %v519_v63  ;;  %v441_v7 = vpop.f32.mrb[3].mxu0 }
 0x1a2   : > { %v521_v9 = vpop.f32.mrb[3].mxu1  ;;  %854 = vst [vmem:[%s1624_s27 + $0x8] sm:$0xff] %v790_v60  ;;  %886 = vst [vmem:[%s1624_s27 + $0x108] sm:$0xff] %v822_v61  ;;  %v792_v11 = vmul.f32 5.1020408e-05, %v441_v7 }
 0x1a3   : > { %v824_v13 = vmul.f32 5.1020408e-05, %v521_v9  ;;  %855 = vst [vmem:[%s1624_s27 + $0x10] sm:$0xff] %v791_v3  ;;  %887 = vst [vmem:[%s1624_s27 + $0x110] sm:$0xff] %v823_v5 }
 0x1a4   : > { %856 = vst [vmem:[%s1624_s27 + $0x18] sm:$0xff] %v792_v11 }
 0x1a5   : > { %888 = vst [vmem:[%s1624_s27 + $0x118] sm:$0xff] %v824_v13 }
 0x1a6   : > { %v445_v15 = vpop.f32.mrb[4].mxu0  ;;  %v525_v17 = vpop.f32.mrb[4].mxu1 }
 0x1a7   : > { %v793_v19 = vmul.f32 5.1020408e-05, %v445_v15  ;;  %v825_v21 = vmul.f32 5.1020408e-05, %v525_v17  ;;  %v447_v23 = vpop.f32.mrb[5].mxu0  ;;  %v527_v25 = vpop.f32.mrb[5].mxu1 }
 0x1a8   : > { %v794_v27 = vmul.f32 5.1020408e-05, %v447_v23  ;;  %v826_v29 = vmul.f32 5.1020408e-05, %v527_v25  ;;  %v449_v31 = vpop.f32.mrb[6].mxu0  ;;  %v529_v0 = vpop.f32.mrb[6].mxu1 }
 0x1a9   : > { %857 = vst [vmem:[%s1624_s27 + $0x20] sm:$0xff] %v793_v19  ;;  %889 = vst [vmem:[%s1624_s27 + $0x120] sm:$0xff] %v825_v21  ;;  %v795_v1 = vmul.f32 5.1020408e-05, %v449_v31  ;;  %v827_v30 = vmul.f32 5.1020408e-05, %v529_v0 }
 0x1aa   : > { %v451_v32 = vpop.f32.mrb[7].mxu0  ;;  %v531_v33 = vpop.f32.mrb[7].mxu1  ;;  %858 = vst [vmem:[%s1624_s27 + $0x28] sm:$0xff] %v794_v27  ;;  %890 = vst [vmem:[%s1624_s27 + $0x128] sm:$0xff] %v826_v29 }
 0x1ab   : > { %v796_v2 = vmul.f32 5.1020408e-05, %v451_v32  ;;  %v828_v34 = vmul.f32 5.1020408e-05, %v531_v33  ;;  %859 = vst [vmem:[%s1624_s27 + $0x30] sm:$0xff] %v795_v1  ;;  %891 = vst [vmem:[%s1624_s27 + $0x130] sm:$0xff] %v827_v30 }
 0x1ad   : > { %860 = vst [vmem:[%s1624_s27 + $0x38] sm:$0xff] %v796_v2  ;;  %892 = vst [vmem:[%s1624_s27 + $0x138] sm:$0xff] %v828_v34 }
 0x1ae   : > { %v455_v4 = vpop.f32.mrb[8].mxu0  ;;  %v535_v35 = vpop.f32.mrb[8].mxu1 }
 0x1af   : > { %v797_v36 = vmul.f32 5.1020408e-05, %v455_v4  ;;  %v829_v37 = vmul.f32 5.1020408e-05, %v535_v35  ;;  %v457_v38 = vpop.f32.mrb[9].mxu0  ;;  %v537_v39 = vpop.f32.mrb[9].mxu1 }
 0x1b0   : > { %v798_v40 = vmul.f32 5.1020408e-05, %v457_v38  ;;  %v830_v22 = vmul.f32 5.1020408e-05, %v537_v39  ;;  %v459_v24 = vpop.f32.mrb[10].mxu0  ;;  %v539_v41 = vpop.f32.mrb[10].mxu1 }
 0x1b1   : > { %861 = vst [vmem:[%s1624_s27 + $0x40] sm:$0xff] %v797_v36  ;;  %893 = vst [vmem:[%s1624_s27 + $0x140] sm:$0xff] %v829_v37  ;;  %v799_v6 = vmul.f32 5.1020408e-05, %v459_v24  ;;  %v831_v26 = vmul.f32 5.1020408e-05, %v539_v41 }
 0x1b2   : > { %v461_v28 = vpop.f32.mrb[11].mxu0  ;;  %v541_v43 = vpop.f32.mrb[11].mxu1  ;;  %862 = vst [vmem:[%s1624_s27 + $0x48] sm:$0xff] %v798_v40  ;;  %894 = vst [vmem:[%s1624_s27 + $0x148] sm:$0xff] %v830_v22 }
 0x1b3   : > { %v800_v8 = vmul.f32 5.1020408e-05, %v461_v28  ;;  %v832_v45 = vmul.f32 5.1020408e-05, %v541_v43  ;;  %863 = vst [vmem:[%s1624_s27 + $0x50] sm:$0xff] %v799_v6  ;;  %895 = vst [vmem:[%s1624_s27 + $0x150] sm:$0xff] %v831_v26 }
 0x1b5   : > { %864 = vst [vmem:[%s1624_s27 + $0x58] sm:$0xff] %v800_v8  ;;  %896 = vst [vmem:[%s1624_s27 + $0x158] sm:$0xff] %v832_v45 }
 0x1b6   : > { %v465_v47 = vpop.f32.mrb[12].mxu0  ;;  %v545_v42 = vpop.f32.mrb[12].mxu1 }
 0x1b7   : > { %v801_v49 = vmul.f32 5.1020408e-05, %v465_v47  ;;  %v833_v44 = vmul.f32 5.1020408e-05, %v545_v42  ;;  %v467_v51 = vpop.f32.mrb[13].mxu0  ;;  %v547_v10 = vpop.f32.mrb[13].mxu1 }
 0x1b8   : > { %v802_v12 = vmul.f32 5.1020408e-05, %v467_v51  ;;  %v834_v46 = vmul.f32 5.1020408e-05, %v547_v10  ;;  %v469_v53 = vpop.f32.mrb[14].mxu0  ;;  %v549_v48 = vpop.f32.mrb[14].mxu1 }
 0x1b9   : > { %865 = vst [vmem:[%s1624_s27 + $0x60] sm:$0xff] %v801_v49  ;;  %897 = vst [vmem:[%s1624_s27 + $0x160] sm:$0xff] %v833_v44  ;;  %v803_v55 = vmul.f32 5.1020408e-05, %v469_v53  ;;  %v835_v14 = vmul.f32 5.1020408e-05, %v549_v48 }
 0x1ba   : > { %v471_v16 = vpop.f32.mrb[15].mxu0  ;;  %v551_v50 = vpop.f32.mrb[15].mxu1  ;;  %866 = vst [vmem:[%s1624_s27 + $0x68] sm:$0xff] %v802_v12  ;;  %898 = vst [vmem:[%s1624_s27 + $0x168] sm:$0xff] %v834_v46 }
 0x1bb   : > { %v804_v57 = vmul.f32 5.1020408e-05, %v471_v16  ;;  %v836_v52 = vmul.f32 5.1020408e-05, %v551_v50  ;;  %867 = vst [vmem:[%s1624_s27 + $0x70] sm:$0xff] %v803_v55  ;;  %899 = vst [vmem:[%s1624_s27 + $0x170] sm:$0xff] %v835_v14 }
 0x1bd   : > { %868 = vst [vmem:[%s1624_s27 + $0x78] sm:$0xff] %v804_v57  ;;  %900 = vst [vmem:[%s1624_s27 + $0x178] sm:$0xff] %v836_v52 }
 0x1be   : > { %v475_v18 = vpop.f32.mrb[16].mxu0  ;;  %v555_v20 = vpop.f32.mrb[16].mxu1 }
 0x1bf   : > { %v805_v54 = vmul.f32 5.1020408e-05, %v475_v18  ;;  %v837_v56 = vmul.f32 5.1020408e-05, %v555_v20  ;;  %v477_v58 = vpop.f32.mrb[17].mxu0  ;;  %v557_v59 = vpop.f32.mrb[17].mxu1 }
 0x1c0   : > { %v806_v60 = vmul.f32 5.1020408e-05, %v477_v58  ;;  %v838_v61 = vmul.f32 5.1020408e-05, %v557_v59  ;;  %v479_v62 = vpop.f32.mrb[18].mxu0  ;;  %v559_v63 = vpop.f32.mrb[18].mxu1 }
 0x1c1   : > { %869 = vst [vmem:[%s1624_s27 + $0x80] sm:$0xff] %v805_v54  ;;  %901 = vst [vmem:[%s1624_s27 + $0x180] sm:$0xff] %v837_v56  ;;  %v807_v3 = vmul.f32 5.1020408e-05, %v479_v62  ;;  %v839_v5 = vmul.f32 5.1020408e-05, %v559_v63 }
 0x1c2   : > { %v481_v7 = vpop.f32.mrb[19].mxu0  ;;  %v561_v9 = vpop.f32.mrb[19].mxu1  ;;  %870 = vst [vmem:[%s1624_s27 + $0x88] sm:$0xff] %v806_v60  ;;  %902 = vst [vmem:[%s1624_s27 + $0x188] sm:$0xff] %v838_v61 }
 0x1c3   : > { %v808_v11 = vmul.f32 5.1020408e-05, %v481_v7  ;;  %v840_v13 = vmul.f32 5.1020408e-05, %v561_v9  ;;  %871 = vst [vmem:[%s1624_s27 + $0x90] sm:$0xff] %v807_v3  ;;  %903 = vst [vmem:[%s1624_s27 + $0x190] sm:$0xff] %v839_v5 }
 0x1c5   : > { %872 = vst [vmem:[%s1624_s27 + $0x98] sm:$0xff] %v808_v11  ;;  %904 = vst [vmem:[%s1624_s27 + $0x198] sm:$0xff] %v840_v13 }
 0x1c6   : > { %v485_v15 = vpop.f32.mrb[20].mxu0  ;;  %v565_v17 = vpop.f32.mrb[20].mxu1 }
 0x1c7   : > { %v809_v19 = vmul.f32 5.1020408e-05, %v485_v15  ;;  %v841_v21 = vmul.f32 5.1020408e-05, %v565_v17  ;;  %v487_v23 = vpop.f32.mrb[21].mxu0  ;;  %v567_v25 = vpop.f32.mrb[21].mxu1 }
 0x1c8   : > { %v810_v27 = vmul.f32 5.1020408e-05, %v487_v23  ;;  %v842_v29 = vmul.f32 5.1020408e-05, %v567_v25  ;;  %v489_v31 = vpop.f32.mrb[22].mxu0  ;;  %v569_v0 = vpop.f32.mrb[22].mxu1 }
 0x1c9   : > { %873 = vst [vmem:[%s1624_s27 + $0xa0] sm:$0xff] %v809_v19  ;;  %905 = vst [vmem:[%s1624_s27 + $0x1a0] sm:$0xff] %v841_v21  ;;  %v811_v1 = vmul.f32 5.1020408e-05, %v489_v31  ;;  %v843_v30 = vmul.f32 5.1020408e-05, %v569_v0 }
 0x1ca   : > { %v491_v32 = vpop.f32.mrb[23].mxu0  ;;  %v571_v33 = vpop.f32.mrb[23].mxu1  ;;  %874 = vst [vmem:[%s1624_s27 + $0xa8] sm:$0xff] %v810_v27  ;;  %906 = vst [vmem:[%s1624_s27 + $0x1a8] sm:$0xff] %v842_v29 }
 0x1cb   : > { %v812_v2 = vmul.f32 5.1020408e-05, %v491_v32  ;;  %v844_v34 = vmul.f32 5.1020408e-05, %v571_v33  ;;  %875 = vst [vmem:[%s1624_s27 + $0xb0] sm:$0xff] %v811_v1  ;;  %907 = vst [vmem:[%s1624_s27 + $0x1b0] sm:$0xff] %v843_v30 }
 0x1cd   : > { %876 = vst [vmem:[%s1624_s27 + $0xb8] sm:$0xff] %v812_v2  ;;  %908 = vst [vmem:[%s1624_s27 + $0x1b8] sm:$0xff] %v844_v34 }
 0x1ce   : > { %v495_v4 = vpop.f32.mrb[24].mxu0  ;;  %v575_v35 = vpop.f32.mrb[24].mxu1 }
 0x1cf   : > { %v813_v36 = vmul.f32 5.1020408e-05, %v495_v4  ;;  %v845_v37 = vmul.f32 5.1020408e-05, %v575_v35  ;;  %v497_v38 = vpop.f32.mrb[25].mxu0  ;;  %v577_v39 = vpop.f32.mrb[25].mxu1 }
 0x1d0   : > { %v814_v40 = vmul.f32 5.1020408e-05, %v497_v38  ;;  %v846_v22 = vmul.f32 5.1020408e-05, %v577_v39  ;;  %v499_v24 = vpop.f32.mrb[26].mxu0  ;;  %v579_v41 = vpop.f32.mrb[26].mxu1 }
 0x1d1   : > { %877 = vst [vmem:[%s1624_s27 + $0xc0] sm:$0xff] %v813_v36  ;;  %909 = vst [vmem:[%s1624_s27 + $0x1c0] sm:$0xff] %v845_v37  ;;  %v815_v6 = vmul.f32 5.1020408e-05, %v499_v24  ;;  %v847_v26 = vmul.f32 5.1020408e-05, %v579_v41 }
 0x1d2   : > { %v501_v28 = vpop.f32.mrb[27].mxu0  ;;  %v581_v43 = vpop.f32.mrb[27].mxu1  ;;  %878 = vst [vmem:[%s1624_s27 + $0xc8] sm:$0xff] %v814_v40  ;;  %910 = vst [vmem:[%s1624_s27 + $0x1c8] sm:$0xff] %v846_v22 }
 0x1d3   : > { %v816_v8 = vmul.f32 5.1020408e-05, %v501_v28  ;;  %v848_v45 = vmul.f32 5.1020408e-05, %v581_v43  ;;  %879 = vst [vmem:[%s1624_s27 + $0xd0] sm:$0xff] %v815_v6  ;;  %911 = vst [vmem:[%s1624_s27 + $0x1d0] sm:$0xff] %v847_v26 }
 0x1d5   : > { %880 = vst [vmem:[%s1624_s27 + $0xd8] sm:$0xff] %v816_v8  ;;  %912 = vst [vmem:[%s1624_s27 + $0x1d8] sm:$0xff] %v848_v45 }
 0x1d6   : > { %v505_v47 = vpop.f32.mrb[28].mxu0  ;;  %v585_v42 = vpop.f32.mrb[28].mxu1 }
 0x1d7   : > { %v817_v49 = vmul.f32 5.1020408e-05, %v505_v47  ;;  %v849_v44 = vmul.f32 5.1020408e-05, %v585_v42  ;;  %v507_v51 = vpop.f32.mrb[29].mxu0  ;;  %v587_v10 = vpop.f32.mrb[29].mxu1 }
 0x1d8   : > { %v818_v12 = vmul.f32 5.1020408e-05, %v507_v51  ;;  %v850_v46 = vmul.f32 5.1020408e-05, %v587_v10  ;;  %v509_v53 = vpop.f32.mrb[30].mxu0  ;;  %v589_v48 = vpop.f32.mrb[30].mxu1 }
 0x1d9   : > { %881 = vst [vmem:[%s1624_s27 + $0xe0] sm:$0xff] %v817_v49  ;;  %913 = vst [vmem:[%s1624_s27 + $0x1e0] sm:$0xff] %v849_v44  ;;  %v819_v55 = vmul.f32 5.1020408e-05, %v509_v53  ;;  %v851_v14 = vmul.f32 5.1020408e-05, %v589_v48 }
 0x1da   : > { %v511_v16 = vpop.f32.mrb[31].mxu0  ;;  %v591_v50 = vpop.f32.mrb[31].mxu1  ;;  %882 = vst [vmem:[%s1624_s27 + $0xe8] sm:$0xff] %v818_v12  ;;  %914 = vst [vmem:[%s1624_s27 + $0x1e8] sm:$0xff] %v850_v46 }
 0x1db   : > { %v820_v57 = vmul.f32 5.1020408e-05, %v511_v16  ;;  %v852_v52 = vmul.f32 5.1020408e-05, %v591_v50  ;;  %883 = vst [vmem:[%s1624_s27 + $0xf0] sm:$0xff] %v819_v55  ;;  %915 = vst [vmem:[%s1624_s27 + $0x1f0] sm:$0xff] %v851_v14 }
 0x1dd   : > { %884 = vst [vmem:[%s1624_s27 + $0xf8] sm:$0xff] %v820_v57  ;;  %916 = vst [vmem:[%s1624_s27 + $0x1f8] sm:$0xff] %v852_v52 }
 0x1de   : > { %1204 = shalt.err (!%p1201_p5)
}
 0x1df   : > { %s1205_s22 = scalar_lea.hbm %s1689_s5, 8192  ;;  %s1209_s25 = scalar_lea.hbm %s1747_s1, 16384 }
 0x1e0   : > { %p1206_p4 = scmp.ne.s32.totalorder %s1689_s5, %s1205_s22  ;;  %p1210_p12 = scmp.lt.u32.totalorder %s1689_s5, %s1747_s1 }
 0x1e1   : > { %p1211_p1 = scmp.lt.u32.totalorder %s1209_s25, %s1205_s22  ;;  %p1213_p8 = scmp.lt.u32.totalorder %s1205_s22, %s1689_s5 }
 0x1e2   : > { %p1207_p7 = pnand %p1206_p4, %p1755_p9 }
 0x1e3   : > { %p1212_p3 = por %p1211_p1, %p1210_p12 }
 0x1e4   : > { %p1208_p10 = pneg %p1207_p7 }
 0x1e5   : > { %p1214_p11 = por %p1213_p8, %p1212_p3 }
 0x1e7   : > { %p1215_p0 = pnand %p1214_p11, %p1208_p10 }
 0x1e9   : > { %1218 = shalt.err (!%p1215_p0)
}
 0x1ea   : > { %s1279_s4 = smov 256   ;;  %s1280_s18 = smov 16  }
 0x1eb   : > { %1097 = dma.vmem_to_hbm [thread:$0]  (%p1755_p9), %s1691_s30, 8192, %s1689_s5, %s918_s12, %s1279_s4, %s1279_s4, %s1280_s18  }
 0x1ec PF: > { %s946_s27 = sand.u32 1, %s1253_s6   ;;  %p1756_p6 = scmp.ne.s32.totalorder %s1752_s21, 0 }
 0x1ed   : > { %p1757_p13 = scmp.ge.s32.totalorder %s1273_s11, 2  ;;  %s947_s29 = scalar_lea.sflag [#allocation5], %s946_s27 }
 0x1ef   : > { %p1104_p2 = pnand %p1757_p13, %p1756_p6 }
 0x1f1   : > { %1248 = dma.done.wait (!%p1104_p2), %s947_s29, 8192  }
 0x1f2   : > { %1250 = vsyncadd (!%p1104_p2), %s947_s29, 4294959104  ;;  %s17_s11 = sadd.s32 1, %s1273_s11   ;;  %s1758_s6 = smov %s1257_s7 }
 0x1f3   : > { %p14_p5 = scmp.ge.s32.totalorder %s17_s11, 4   ;;  %s1759_s7 = smov %s1261_s8 }
 0x1f4   : > { %s1760_s8 = smov %s1347_s20  ;;  %s1761_s9 = smov %s1269_s10 }
 0x1f5   : > { %s1762_s10 = smov %s1764_s14  ;;  %16 = sbr.rel (!%p14_p5) target bundleno = 6 (0x6), region = 77 }
 0x1fc   :  { %952 = vsyncpa [#allocation4], 1 }
 0x1fd   :  { %954 = vsyncpa [#allocation4 + $0x1], 1 }
 0x1fe   :  { %955 = vsyncpa [#allocation5], 1 }
 0x1ff   :  { %957 = vsyncpa [#allocation5 + $0x1], 1 }

</bundles_post_ra>
